<compile_context>
chip_gen: v6e
topology: v6e:2x2x1
jax: 0.10.0
libtpu: 0.0.40
codegen_flags: <defaults>
</compile_context>

<pallas_src>
import functools

import jax
import jax.numpy as jnp
from jax.experimental import pallas as pl
from jax.experimental.pallas import tpu as pltpu

TARGET_DTYPE = jnp.bfloat16


def _rmsnorm_kernel(x_ref, w_ref, o_ref, *, eps):
    # x_ref: (tr, D) tile of rows; w_ref: (1, D) weight; o_ref: (tr, D) output.
    # Single upcast; the compiler keeps this fused per-vreg rather than holding
    # a persistent tr x D f32 temporary, so live pressure stays ~bf16-sized.
    xf = x_ref[...].astype(jnp.float32)
    ms = jnp.mean(xf * xf, axis=-1, keepdims=True)        # mean of squares (f32, XLU)
    inv = jax.lax.rsqrt(ms + eps)                         # (tr, 1), EUP slot
    w = w_ref[...].astype(jnp.float32)                    # (1, D) broadcast over rows
    o_ref[...] = ((xf * inv) * w).astype(o_ref.dtype)


def _vmem_capacity_bytes():
    """Best-effort query of physical VMEM; conservative (v7x-sized) fallback."""
    try:
        return int(pltpu.get_tpu_info().vmem_capacity_bytes)
    except Exception:
        return 64 * 1024 * 1024


def _choose_block_rows(rows, dim, vmem_cap):
    # Per-row VMEM cost: double-buffered bf16 input + double-buffered bf16
    # output (4 buffers * 2 B) plus ~one f32-sized live intermediate (4 B).
    bytes_per_row = dim * (4 * 2 + 4)
    budget = min(vmem_cap // 4, 32 * 1024 * 1024)   # leave pipelining headroom
    target = max(16, min(budget // max(bytes_per_row, 1), 1024))
    target = (target // 16) * 16                    # bf16 sublane packing (and /8 rule)
    needed = ((rows + 15) // 16) * 16               # never bigger than the array needs
    return max(16, min(target, needed))


def rmsnorm(x, weight, eps=1e-6, block_rows=None):
    """RMSNorm over the last axis. Output dtype == input dtype (bf16 here)."""
    orig_shape = x.shape
    dim = orig_shape[-1]
    assert weight.shape == (dim,)

    x2d = x.reshape(-1, dim)
    rows = x2d.shape[0]
    w2d = weight.reshape(1, dim)

    vmem_cap = _vmem_capacity_bytes()
    if block_rows is None:
        block_rows = _choose_block_rows(rows, dim, vmem_cap)

    grid = (pl.cdiv(rows, block_rows),)

    # Raise the scoped VMEM limit enough for the double-buffered in/out tiles,
    # the resident weight and f32 slack, but never past half the physical VMEM.
    tile_bytes = block_rows * dim * 2
    need = 4 * tile_bytes + block_rows * dim * 4 + 4 * dim * 2
    vmem_limit = int(min(vmem_cap // 2, max(3 * need, 32 * 1024 * 1024)))

    out = pl.pallas_call(
        functools.partial(_rmsnorm_kernel, eps=eps),
        out_shape=jax.ShapeDtypeStruct((rows, dim), x.dtype),
        grid_spec=pltpu.PrefetchScalarGridSpec(
            num_scalar_prefetch=0,
            grid=grid,
            in_specs=[
                pl.BlockSpec((block_rows, dim), lambda i: (i, 0)),  # big row tile of x
                pl.BlockSpec((1, dim), lambda i: (0, 0)),           # weight, VMEM-resident
            ],
            out_specs=pl.BlockSpec((block_rows, dim), lambda i: (i, 0)),
        ),
        compiler_params=pltpu.CompilerParams(
            dimension_semantics=("parallel",),   # shards the row grid across TCs on v7x
            vmem_limit_bytes=vmem_limit,
        ),
    )(x2d, w2d)

    return out.reshape(orig_shape)


if __name__ == "__main__":
    key = jax.random.PRNGKey(0)
    batch, seq, hidden = 2, 8, 32

    x = jax.random.normal(key, (batch, seq, hidden), dtype=jnp.float32).astype(TARGET_DTYPE)
    # Module inits weight to ones(dim); perturb slightly (deterministically) so
    # the weight multiply is actually exercised.
    weight = (jnp.ones((hidden,), dtype=jnp.float32)
              + 0.01 * jnp.arange(hidden, dtype=jnp.float32)).astype(TARGET_DTYPE)

    out = rmsnorm(x, weight, eps=1e-6)
    out = jax.block_until_ready(out)

    # Reference in plain JAX (fp32 compute, cast back) for sanity.
    xf = x.astype(jnp.float32)
    ref = (xf * jax.lax.rsqrt(jnp.mean(xf * xf, axis=-1, keepdims=True) + 1e-6)
           * weight.astype(jnp.float32)).astype(TARGET_DTYPE)

    assert out.shape == x.shape and out.dtype == TARGET_DTYPE
    assert jnp.allclose(out.astype(jnp.float32), ref.astype(jnp.float32),
                        atol=2e-2, rtol=2e-2)

    print("KERNEL_OK")
</pallas_src>

<mosaic_0001>
module attributes {stable_mosaic.version = 11 : i64} {
  func.func @_rmsnorm_kernel(%arg0: i32, %arg1: memref<16x32xbf16, #tpu.memory_space<vmem>>, %arg2: memref<1x32xbf16, #tpu.memory_space<vmem>>, %arg3: memref<16x32xbf16, #tpu.memory_space<vmem>>) attributes {dimension_semantics = [#tpu.dimension_semantics<parallel>], iteration_bounds = array<i64: 1>, scalar_prefetch = 0 : i64, scratch_operands = 0 : i64, tpu.core_type = #tpu.core_type<tc>, window_params = [{transform_indices = @transform_0, window_bounds = array<i64: 16, 32>}, {pipeline_mode = #tpu.pipeline_mode<synchronous>, transform_indices = @transform_1, window_bounds = array<i64: 1, 32>}, {transform_indices = @transform_2, window_bounds = array<i64: 16, 32>}]} {
    %c0 = arith.constant 0 : index
    %c0_0 = arith.constant 0 : index
    %0 = vector.load %arg1[%c0, %c0_0] : memref<16x32xbf16, #tpu.memory_space<vmem>>, vector<16x32xbf16>
    %1 = arith.extf %0 : vector<16x32xbf16> to vector<16x32xf32>
    %2 = arith.mulf %1, %1 : vector<16x32xf32>
    %cst = arith.constant dense<0.000000e+00> : vector<16xf32>
    %3 = vector.multi_reduction <add>, %2, %cst [1] : vector<16x32xf32> to vector<16xf32>
    %4 = vector.shape_cast %3 : vector<16xf32> to vector<16x1xf32>
    %cst_1 = arith.constant 3.200000e+01 : f32
    %5 = vector.broadcast %cst_1 : f32 to vector<16x1xf32>
    %6 = arith.divf %4, %5 : vector<16x1xf32>
    %cst_2 = arith.constant 9.99999997E-7 : f32
    %7 = vector.broadcast %cst_2 : f32 to vector<16x1xf32>
    %8 = arith.addf %6, %7 : vector<16x1xf32>
    %9 = math.rsqrt %8 : vector<16x1xf32>
    %c0_3 = arith.constant 0 : index
    %c0_4 = arith.constant 0 : index
    %10 = vector.load %arg2[%c0_3, %c0_4] : memref<1x32xbf16, #tpu.memory_space<vmem>>, vector<1x32xbf16>
    %11 = arith.extf %10 : vector<1x32xbf16> to vector<1x32xf32>
    %12 = vector.broadcast %9 : vector<16x1xf32> to vector<16x32xf32>
    %13 = arith.mulf %1, %12 : vector<16x32xf32>
    %14 = vector.broadcast %11 : vector<1x32xf32> to vector<16x32xf32>
    %15 = arith.mulf %13, %14 : vector<16x32xf32>
    %16 = arith.truncf %15 : vector<16x32xf32> to vector<16x32xbf16>
    %c0_5 = arith.constant 0 : index
    %c0_6 = arith.constant 0 : index
    %17 = vector.load %arg3[%c0_5, %c0_6] : memref<16x32xbf16, #tpu.memory_space<vmem>>, vector<16x32xbf16>
    tpu.vector_store %arg3[%c0_5, %c0_6], %16 {strides = array<i32>} : memref<16x32xbf16, #tpu.memory_space<vmem>>, vector<16x32xbf16>,
    return
  }
  func.func @transform_0(%arg0: i32) -> (i32, i32) {
    %c0_i32 = arith.constant 0 : i32
    %c0_i32_0 = arith.constant 0 : i32
    return %arg0, %c0_i32 : i32, i32
  }
  func.func @transform_1(%arg0: i32) -> (i32, i32) {
    %c0_i32 = arith.constant 0 : i32
    %c0_i32_0 = arith.constant 0 : i32
    %c0_i32_1 = arith.constant 0 : i32
    return %c0_i32, %c0_i32_0 : i32, i32
  }
  func.func @transform_2(%arg0: i32) -> (i32, i32) {
    %c0_i32 = arith.constant 0 : i32
    %c0_i32_0 = arith.constant 0 : i32
    return %arg0, %c0_i32 : i32, i32
  }
}

</mosaic_0001>

<bundles_post_ra>
// kernel: tpu_custom_call.1
= control target key start
LH: loop header
LB: loop body
LE: loop exit
PB: predicated region body
PF: predicated region fallthrough
CT: control target
= control target key end

     0   :  { %7 = vsyncpa [#allocation3], 0  ;;  %s178_s0 = inlined_call_operand.hbm [shape: bf16[16,32], index: 0, kind: input, shape index: {}]   ;;  %s179_s1 = inlined_call_operand.vmem [shape: bf16[1,32], index: 1, kind: input, shape index: {}]   ;;  %s180_s2 = inlined_call_operand.hbm [shape: bf16[16,32], index: 2, kind: output, shape index: {}]  }
   0x1   :  { %8 = vsyncpa [#allocation4], 0  ;;  %s144_s9 = smov [#allocation2]  }
   0x2   :  { %s14_s10 = sshll.u32 %s144_s9, 4  ;;  %s15_s10 = int_to_ptr.vmem [resolvable:$true] %s14_s10 }
   0x3   :  { %s108_s11 = scalar_lea.vmem %s15_s10, 128  ;;  %p113_p1 = scmp.lt.s32.totalorder %s15_s10, %s15_s10 }
   0x4   :  { %p109_p0 = scmp.ne.s32.totalorder %s15_s10, %s108_s11  ;;  %p114_p2 = scmp.lt.s32.totalorder %s108_s11, %s108_s11 }
   0x6   :  { %p115_p3 = por %p114_p2, %p113_p1 }
   0x8   :  { %p116_p4 = pnand %p115_p3, %p109_p0 }
   0xa   :  { %119 = shalt.err (!%p116_p4)
}
   0xb   :  { %s145_s12 = smov 64   ;;  %s146_s13 = smov 4  }
   0xc   :  { %20 = dma.hbm_to_vmem [thread:$0]  %s178_s0, 128, %s15_s10, [#allocation3], %s145_s12, %s145_s12, %s146_s13  }
   0xd   :  { %140 = dma.done.wait [#allocation3], 128  }
   0xe   :  { %141 = vsyncadd [#allocation3], 4294967168  ;;  %v89_v0 = vld [vmem:[#allocation2] sm:$0xff]   ;;  %vm32_vm0 = vcmask 261120   ;;  %v50_v12 = vlaneseq  ;;  %vm64_vm1 = vcmask 257024   ;;  %s147_s17 = smov [#allocation5]  }
   0xf   :  { %v90_v1 = vunpack.c.l.bf16 %v89_v0  ;;  %v91_v2 = vunpack.c.h.bf16 %v89_v0  ;;  %v46_v15 = vld [vmem:[%s179_s1] sm:$0x1]  ;;  %s72_s18 = sshll.u32 %s147_s17, 4  ;;  %s73_s18 = int_to_ptr.vmem [resolvable:$true] %s72_s18 }
  0x10   :  { %v51_v14 = vshrl.u32 %v50_v12, 7  ;;  %v47_v16 = vunpack.c.l.bf16 %v46_v15  ;;  %s120_s19 = scalar_lea.vmem %s73_s18, 128  ;;  %p125_p6 = scmp.lt.s32.totalorder %s73_s18, %s73_s18 }
  0x11   :  { %v30_v3 = vmul.f32 %v90_v1, %v90_v1  ;;  %v31_v4 = vmul.f32 %v91_v2, %v91_v2  ;;  %p121_p5 = scmp.ne.s32.totalorder %s73_s18, %s120_s19  ;;  %p126_p7 = scmp.lt.s32.totalorder %s120_s19, %s120_s19 }
  0x12   :  { %v52_v17 = vsub.s32 0, %v51_v14 }
  0x13   :  { %v33_v5 = vsel %vm32_vm0, %v30_v3, 0.0  ;;  %v36_v6 = vsel %vm32_vm0, %v31_v4, 0.0  ;;  %p127_p8 = por %p126_p7, %p125_p6 }
  0x14   :  { %34 = vadd.xlane.f32.xlu0 %v33_v5  ;;  %v53_v18 = vrot.slane %v47_v16, %v52_v17 }
  0x15   :  { %p128_p9 = pnand %p127_p8, %p121_p5 }
  0x18   :  { %37 = vadd.xlane.f32.xlu0 %v36_v6 }
  0x9d   :  { %v35_v7 = vpop.xlane.xlu0 %34 }
  0x9e   :  { %v40_v8 = vmul.f32 0.03125, %v35_v7 }
  0xa0   :  { %v42_v9 = vadd.f32 1e-06, %v40_v8 }
  0xa1   :  { %v38_v10 = vpop.xlane.xlu0 %37 }
  0xa2   :  { %96 = vrsqrt.f32 %v42_v9  ;;  %v41_v11 = vmul.f32 0.03125, %v38_v10 }
  0xa4   :  { %v43_v13 = vadd.f32 1e-06, %v41_v11 }
  0xa6   :  { %98 = vrsqrt.f32 %v43_v13 }
  0xaf   :  { %v97_v19 = vpop.eup %96 }
  0xb0   :  { %v48_v20 = vmul.f32 %v97_v19, %v90_v1 }
  0xb2   :  { %v54_v21 = vmul.f32 %v53_v18, %v48_v20 }
  0xb3   :  { %v99_v22 = vpop.eup %98 }
  0xb4   :  { %v49_v23 = vmul.f32 %v99_v22, %v91_v2  ;;  %v86_v24 = vpack.c.bf16 %v54_v21, %v54_v21 }
  0xb6   :  { %v55_v25 = vmul.f32 %v53_v18, %v49_v23  ;;  %65 = vst.msk [vmem:[#allocation5] sm:$0xf] %vm64_vm1, %v86_v24 }
  0xb8   :  { %v87_v26 = vpack.c.bf16 %v55_v25, %v55_v25 }
  0xba   :  { %66 = vst.msk [vmem:[#allocation5 + $0x4] sm:$0xf] %vm64_vm1, %v87_v26 }
  0xbb   :  { %131 = shalt.err (!%p128_p9)
}
  0xbc   :  { %78 = dma.vmem_to_hbm [thread:$0]  %s73_s18, 128, %s180_s2, [#allocation4], %s145_s12, %s145_s12, %s146_s13  }
  0xbd   :  { %142 = dma.done.wait [#allocation4], 128  }
  0xbe   :  { %143 = vsyncadd [#allocation4], 4294967168 }
  0xbf   :  { %82 = vsyncpa [#allocation3], 1 }
  0xc0   :  { %83 = vsyncpa [#allocation4], 1 }

</bundles_post_ra>
